<compile_context>
chip_gen: v5e
topology: v5e:2x2
jax: 0.10.0
libtpu: 0.0.40
codegen_flags: <defaults>
</compile_context>

<pallas_src>
import functools

import numpy as np
import jax
import jax.numpy as jnp
from jax import lax
from jax.experimental import pallas as pl
from jax.experimental.pallas import tpu as pltpu


def _layer_norm(x, gamma, beta, eps=1e-6):
    mu = jnp.mean(x, axis=-1, keepdims=True)
    xc = x - mu
    var = jnp.mean(xc * xc, axis=-1, keepdims=True)
    return xc * lax.rsqrt(var + eps) * gamma + beta


def _encoder_layer_kernel(x_emb_ref, bias_ref, pos_ref, ln0_g_ref, ln0_b_ref,
                          wqkv_ref, wo_ref, ln1_g_ref, ln1_b_ref,
                          w1_ref, b1_ref, w2_ref, b2_ref,
                          ln2_g_ref, ln2_b_ref,
                          out_ref, x_sc,
                          *, n_head, d_k, d_v, mm_dtype):
    """One (batch element, encoder layer) pair per grid step.

    x_emb_ref : VMEM f32 (1, T, D)   embedded (+scaled) tokens
    bias_ref  : VMEM f32 (1, 1, T)   additive key-mask bias (0 valid / -1e9 pad)
    pos_ref   : VMEM f32 (T, D)      sinusoid positional table slice
    per-layer weights are blocked (1, ...) along the layer grid axis
    out_ref   : VMEM f32 (1, T, D)   written on the last layer only
    x_sc      : VMEM f32 (T, D)      activation carried across the layer axis
    """
    l = pl.program_id(1)
    n_layers = pl.num_programs(1)

    def mm(a, b):
        return jnp.dot(a.astype(mm_dtype), b.astype(mm_dtype),
                       preferred_element_type=jnp.float32)

    # First layer of this batch element: positional encoding + initial LayerNorm.
    @pl.when(l == 0)
    def _():
        x0 = x_emb_ref[0].astype(jnp.float32) + pos_ref[...]
        x_sc[...] = _layer_norm(x0, ln0_g_ref[...], ln0_b_ref[...])

    x = x_sc[...]
    mask_bias = bias_ref[0]                         # (1, T) -> broadcasts over query rows

    # ---- Multi-head self-attention + Add & Norm -----------------------------
    residual = x
    qkv = mm(x, wqkv_ref[0])                        # (T, 2*H*dk + H*dv), one MXU push
    q = qkv[:, :n_head * d_k]                       # 1/sqrt(d_k) already folded into Wq
    k = qkv[:, n_head * d_k:2 * n_head * d_k]
    v = qkv[:, 2 * n_head * d_k:]

    heads = []
    for h in range(n_head):                         # static, small head count
        qh = q[:, h * d_k:(h + 1) * d_k]            # (T, dk)
        kh = k[:, h * d_k:(h + 1) * d_k]
        vh = v[:, h * d_v:(h + 1) * d_v]
        # scores = qh @ kh.T without materializing a transpose.
        scores = lax.dot_general(qh.astype(mm_dtype), kh.astype(mm_dtype),
                                 (((1,), (1,)), ((), ())),
                                 preferred_element_type=jnp.float32)   # (T, T)
        scores = scores + mask_bias
        scores = scores - jnp.max(scores, axis=-1, keepdims=True)
        p = jnp.exp(scores)
        p = p * pl.reciprocal(jnp.sum(p, axis=-1, keepdims=True), approx=False)
        heads.append(mm(p, vh))                     # (T, dv)

    attn = jnp.concatenate(heads, axis=-1)          # (T, H*dv)
    attn_out = mm(attn, wo_ref[0])                  # single full-width Wo matmul
    x = _layer_norm(attn_out + residual, ln1_g_ref[0], ln1_b_ref[0])

    # ---- Position-wise feed-forward + Add & Norm -----------------------------
    residual = x
    hmid = jnp.maximum(mm(x, w1_ref[0]) + b1_ref[0], 0.0)   # (T, d_inner)
    y = mm(hmid, w2_ref[0]) + b2_ref[0]                     # (T, D)
    x = _layer_norm(y + residual, ln2_g_ref[0], ln2_b_ref[0])

    x_sc[...] = x

    @pl.when(l == n_layers - 1)
    def _():
        out_ref[0, :, :] = x.astype(out_ref.dtype)


def encoder_pallas(src_seq, src_mask, params, *, n_head, d_k, d_v,
                   scale_emb=False, matmul_dtype=jnp.float32):
    """src_seq: (B, T) int32 token ids; src_mask: (B, 1, T) bool/int (1 = valid).

    params layout (already in "x @ W" orientation; transpose PyTorch (out,in) weights
    to (in,out) when importing a real state dict):
      emb (V,D); pos_table (n_position,D); ln0_{g,b} (1,D);
      wq/wk/wv (L,D,H*dk|dv); wo (L,H*dv,D); ln1_{g,b} (L,1,D);
      w1 (L,D,d_inner); b1 (L,1,d_inner); w2 (L,d_inner,D); b2 (L,1,D); ln2_{g,b} (L,1,D)
    Set matmul_dtype=jnp.bfloat16 for MXU-native throughput (f32 accumulation kept).
    Returns (enc_output,) with enc_output of shape (B, T, D).
    """
    B, T = src_seq.shape
    D = params["emb"].shape[1]
    L = params["wq"].shape[0]
    d_inner = params["w1"].shape[-1]
    h_dk = n_head * d_k
    h_dv = n_head * d_v
    w_qkv = 2 * h_dk + h_dv

    # ---- Glue (plain JAX): embedding gather, scaling, pos slice, mask bias ----
    x_emb = jnp.take(params["emb"], src_seq, axis=0).astype(jnp.float32)    # (B, T, D)
    if scale_emb:
        x_emb = x_emb * (D ** 0.5)
    pos = params["pos_table"][:T].astype(jnp.float32)                       # (T, D)
    mask_bias = jnp.where(src_mask.reshape(B, 1, T).astype(bool),
                          0.0, -1e9).astype(jnp.float32)                    # (B, 1, T)

    # ---- One-time parameter transforms (import-time, not per-call cost) -------
    inv_temp = 1.0 / float(np.sqrt(d_k))
    wqkv = jnp.concatenate([params["wq"] * inv_temp, params["wk"], params["wv"]],
                           axis=-1)                                          # (L, D, w_qkv)
    wdt = matmul_dtype   # ship matmul weights in the operand dtype (no per-step VPU cast)
    wqkv = wqkv.astype(wdt)
    wo = params["wo"].astype(wdt)
    w1 = params["w1"].astype(wdt)
    w2 = params["w2"].astype(wdt)

    weight_args = [
        pos, params["ln0_g"], params["ln0_b"],
        wqkv, wo, params["ln1_g"], params["ln1_b"],
        w1, params["b1"], w2, params["b2"],
        params["ln2_g"], params["ln2_b"],
    ]

    in_specs = [
        pl.BlockSpec((1, T, D), lambda b, l: (b, 0, 0)),         # x_emb (resident per b)
        pl.BlockSpec((1, 1, T), lambda b, l: (b, 0, 0)),         # mask bias
        pl.BlockSpec((T, D), lambda b, l: (0, 0)),               # pos table
        pl.BlockSpec((1, D), lambda b, l: (0, 0)),               # ln0_g
        pl.BlockSpec((1, D), lambda b, l: (0, 0)),               # ln0_b
        pl.BlockSpec((1, D, w_qkv), lambda b, l: (l, 0, 0)),     # wqkv (per-layer block)
        pl.BlockSpec((1, h_dv, D), lambda b, l: (l, 0, 0)),      # wo
        pl.BlockSpec((1, 1, D), lambda b, l: (l, 0, 0)),         # ln1_g
        pl.BlockSpec((1, 1, D), lambda b, l: (l, 0, 0)),         # ln1_b
        pl.BlockSpec((1, D, d_inner), lambda b, l: (l, 0, 0)),   # w1
        pl.BlockSpec((1, 1, d_inner), lambda b, l: (l, 0, 0)),   # b1
        pl.BlockSpec((1, d_inner, D), lambda b, l: (l, 0, 0)),   # w2
        pl.BlockSpec((1, 1, D), lambda b, l: (l, 0, 0)),         # b2
        pl.BlockSpec((1, 1, D), lambda b, l: (l, 0, 0)),         # ln2_g
        pl.BlockSpec((1, 1, D), lambda b, l: (l, 0, 0)),         # ln2_b
    ]

    # ---- VMEM budget: ~2 layers of weights (double-buffered) + activations ----
    wbytes = jnp.dtype(wdt).itemsize
    per_layer_w = (D * w_qkv + h_dv * D + 2 * D * d_inner) * wbytes \
                  + (2 * d_inner + 5 * D) * 4
    act_bytes = 4 * T * D * 4 + T * 4            # x_emb/out/pos/scratch blocks + mask
    interm = (n_head * T * T + T * (w_qkv + d_inner) + 6 * T * D) * 4
    vmem_bytes = int(2 * (2 * per_layer_w + act_bytes) + interm) + (4 << 20)
    vmem_bytes = max(vmem_bytes, 32 << 20)
    vmem_bytes = min(vmem_bytes, 56 << 20)       # stay under v7x's 64 MiB physical VMEM

    kernel = functools.partial(_encoder_layer_kernel, n_head=n_head, d_k=d_k,
                               d_v=d_v, mm_dtype=matmul_dtype)

    out = pl.pallas_call(
        kernel,
        out_shape=jax.ShapeDtypeStruct((B, T, D), jnp.float32),
        grid=(B, L),
        in_specs=in_specs,
        out_specs=pl.BlockSpec((1, T, D), lambda b, l: (b, 0, 0)),
        scratch_shapes=[pltpu.VMEM((T, D), jnp.float32)],
        compiler_params=pltpu.CompilerParams(
            dimension_semantics=("parallel", "arbitrary"),
            vmem_limit_bytes=vmem_bytes),
    )(x_emb, mask_bias, *weight_args)
    return (out,)


# ----------------------------------------------------------------------------
# Pure-JAX reference of the PyTorch forward (eval mode) for correctness checks.
# ----------------------------------------------------------------------------
def _reference(src_seq, src_mask, params, *, n_head, d_k, d_v, scale_emb=False):
    D = params["emb"].shape[1]
    B, T = src_seq.shape
    L = params["wq"].shape[0]

    x = params["emb"][src_seq].astype(jnp.float32)
    if scale_emb:
        x = x * (D ** 0.5)
    x = x + params["pos_table"][None, :T]
    x = _layer_norm(x, params["ln0_g"], params["ln0_b"])

    mask4 = src_mask.astype(bool)[:, None, :, :]            # (B, 1, 1, T)
    for l in range(L):
        residual = x
        q = (x @ params["wq"][l]).reshape(B, T, n_head, d_k).transpose(0, 2, 1, 3)
        k = (x @ params["wk"][l]).reshape(B, T, n_head, d_k).transpose(0, 2, 1, 3)
        v = (x @ params["wv"][l]).reshape(B, T, n_head, d_v).transpose(0, 2, 1, 3)
        attn = jnp.einsum("bhqd,bhkd->bhqk", q, k) / np.sqrt(d_k)
        attn = jnp.where(mask4, attn, -1e9)
        attn = jax.nn.softmax(attn, axis=-1)
        o = jnp.einsum("bhqk,bhkd->bhqd", attn, v)
        o = o.transpose(0, 2, 1, 3).reshape(B, T, n_head * d_v) @ params["wo"][l]
        x = _layer_norm(o + residual, params["ln1_g"][l], params["ln1_b"][l])
        residual = x
        h = jax.nn.relu(x @ params["w1"][l] + params["b1"][l])
        y = h @ params["w2"][l] + params["b2"][l]
        x = _layer_norm(y + residual, params["ln2_g"][l], params["ln2_b"][l])
    return x


def _sinusoid_table(n_position, d_hid):
    """Exact replica of PositionalEncoding._get_sinusoid_encoding_table."""
    def angle_vec(pos):
        return [pos / np.power(10000, 2 * (j // 2) / d_hid) for j in range(d_hid)]
    table = np.array([angle_vec(p) for p in range(n_position)], dtype=np.float64)
    table[:, 0::2] = np.sin(table[:, 0::2])
    table[:, 1::2] = np.cos(table[:, 1::2])
    return jnp.asarray(table, dtype=jnp.float32)


if __name__ == "__main__":
    B, T = 2, 8
    n_vocab, d_model = 17, 32
    n_layers, n_head = 2, 2
    d_k = d_v = 16
    d_inner = 64
    pad_idx = 0
    n_position = 200
    scale_emb = False

    key = jax.random.PRNGKey(0)
    ks = jax.random.split(key, 16)

    def u(k, shape, scale):
        return jax.random.uniform(k, shape, jnp.float32, -scale, scale)

    emb = 0.5 * jax.random.normal(ks[0], (n_vocab, d_model), jnp.float32)
    emb = emb.at[pad_idx].set(0.0)              # nn.Embedding(padding_idx=...) row is zero

    sw = 1.0 / np.sqrt(d_model)
    si = 1.0 / np.sqrt(d_inner)
    params = dict(
        emb=emb,
        pos_table=_sinusoid_table(n_position, d_model),
        ln0_g=1.0 + 0.1 * jax.random.normal(ks[1], (1, d_model), jnp.float32),
        ln0_b=0.1 * jax.random.normal(ks[2], (1, d_model), jnp.float32),
        wq=u(ks[3], (n_layers, d_model, n_head * d_k), sw),
        wk=u(ks[4], (n_layers, d_model, n_head * d_k), sw),
        wv=u(ks[5], (n_layers, d_model, n_head * d_v), sw),
        wo=u(ks[6], (n_layers, n_head * d_v, d_model), sw),
        ln1_g=1.0 + 0.1 * jax.random.normal(ks[7], (n_layers, 1, d_model), jnp.float32),
        ln1_b=0.1 * jax.random.normal(ks[8], (n_layers, 1, d_model), jnp.float32),
        w1=u(ks[9], (n_layers, d_model, d_inner), sw),
        b1=u(ks[10], (n_layers, 1, d_inner), sw),
        w2=u(ks[11], (n_layers, d_inner, d_model), si),
        b2=u(ks[12], (n_layers, 1, d_model), si),
        ln2_g=1.0 + 0.1 * jax.random.normal(ks[13], (n_layers, 1, d_model), jnp.float32),
        ln2_b=0.1 * jax.random.normal(ks[14], (n_layers, 1, d_model), jnp.float32),
    )

    # Token ids with trailing padding (lengths 5 and 8) and the matching pad mask.
    lengths = jnp.array([5, 8], dtype=jnp.int32)
    valid_tokens = jax.random.randint(ks[15], (B, T), 1, n_vocab)
    positions = jnp.arange(T)[None, :]
    src_seq = jnp.where(positions < lengths[:, None], valid_tokens, pad_idx).astype(jnp.int32)
    src_mask = (src_seq != pad_idx)[:, None, :]               # (B, 1, T)

    ref = _reference(src_seq, src_mask, params, n_head=n_head, d_k=d_k, d_v=d_v,
                     scale_emb=scale_emb)

    # f32 path: tight parity against the f32 reference.
    (enc_out,) = encoder_pallas(src_seq, src_mask, params, n_head=n_head,
                                d_k=d_k, d_v=d_v, scale_emb=scale_emb)
    enc_out = jax.block_until_ready(enc_out)
    assert enc_out.shape == (B, T, d_model), enc_out.shape
    max_err = jnp.max(jnp.abs(enc_out - ref))
    assert jnp.allclose(enc_out, ref, atol=1e-4, rtol=1e-4), f"max abs err = {max_err}"

    # bf16-operand path (MXU-native, f32 accumulation): loose tolerance only.
    (enc_bf16,) = encoder_pallas(src_seq, src_mask, params, n_head=n_head,
                                 d_k=d_k, d_v=d_v, scale_emb=scale_emb,
                                 matmul_dtype=jnp.bfloat16)
    enc_bf16 = jax.block_until_ready(enc_bf16)
    assert bool(jnp.all(jnp.isfinite(enc_bf16)))
    assert float(jnp.max(jnp.abs(enc_bf16 - ref))) < 0.1

    print("KERNEL_OK")
</pallas_src>

<mosaic_0001>
module attributes {stable_mosaic.version = 11 : i64} {
  func.func @_encoder_layer_kernel(%arg0: i32, %arg1: i32, %arg2: memref<1x8x32xf32, #tpu.memory_space<vmem>>, %arg3: memref<1x1x8xf32, #tpu.memory_space<vmem>>, %arg4: memref<8x32xf32, #tpu.memory_space<vmem>>, %arg5: memref<1x32xf32, #tpu.memory_space<vmem>>, %arg6: memref<1x32xf32, #tpu.memory_space<vmem>>, %arg7: memref<1x32x96xf32, #tpu.memory_space<vmem>>, %arg8: memref<1x32x32xf32, #tpu.memory_space<vmem>>, %arg9: memref<1x1x32xf32, #tpu.memory_space<vmem>>, %arg10: memref<1x1x32xf32, #tpu.memory_space<vmem>>, %arg11: memref<1x32x64xf32, #tpu.memory_space<vmem>>, %arg12: memref<1x1x64xf32, #tpu.memory_space<vmem>>, %arg13: memref<1x64x32xf32, #tpu.memory_space<vmem>>, %arg14: memref<1x1x32xf32, #tpu.memory_space<vmem>>, %arg15: memref<1x1x32xf32, #tpu.memory_space<vmem>>, %arg16: memref<1x1x32xf32, #tpu.memory_space<vmem>>, %arg17: memref<1x8x32xf32, #tpu.memory_space<vmem>>, %arg18: memref<8x32xf32, #tpu.memory_space<vmem>>) attributes {dimension_semantics = [#tpu.dimension_semantics<parallel>, #tpu.dimension_semantics<arbitrary>], iteration_bounds = array<i64: 2, 2>, scalar_prefetch = 0 : i64, scratch_operands = 1 : i64, tpu.core_type = #tpu.core_type<tc>, window_params = [{transform_indices = @transform_0, window_bounds = array<i64: 1, 8, 32>}, {transform_indices = @transform_1, window_bounds = array<i64: 1, 1, 8>}, {pipeline_mode = #tpu.pipeline_mode<synchronous>, transform_indices = @transform_2, window_bounds = array<i64: 8, 32>}, {pipeline_mode = #tpu.pipeline_mode<synchronous>, transform_indices = @transform_3, window_bounds = array<i64: 1, 32>}, {pipeline_mode = #tpu.pipeline_mode<synchronous>, transform_indices = @transform_4, window_bounds = array<i64: 1, 32>}, {transform_indices = @transform_5, window_bounds = array<i64: 1, 32, 96>}, {transform_indices = @transform_6, window_bounds = array<i64: 1, 32, 32>}, {transform_indices = @transform_7, window_bounds = array<i64: 1, 1, 32>}, {transform_indices = @transform_8, window_bounds = array<i64: 1, 1, 32>}, {transform_indices = @transform_9, window_bounds = array<i64: 1, 32, 64>}, {transform_indices = @transform_10, window_bounds = array<i64: 1, 1, 64>}, {transform_indices = @transform_11, window_bounds = array<i64: 1, 64, 32>}, {transform_indices = @transform_12, window_bounds = array<i64: 1, 1, 32>}, {transform_indices = @transform_13, window_bounds = array<i64: 1, 1, 32>}, {transform_indices = @transform_14, window_bounds = array<i64: 1, 1, 32>}, {transform_indices = @transform_15, window_bounds = array<i64: 1, 8, 32>}]} {
    %c0_i32 = arith.constant 0 : i32
    %0 = arith.cmpi eq, %arg1, %c0_i32 : i32
    %1 = arith.extui %0 : i1 to i32
    %c0_i32_0 = arith.constant 0 : i32
    %2 = arith.cmpi ne, %1, %c0_i32_0 : i32
    scf.if %2 {
      %c0_60 = arith.constant 0 : index
      %c0_61 = arith.constant 0 : index
      %c0_62 = arith.constant 0 : index
      %120 = vector.load %arg2[%c0_60, %c0_61, %c0_62] : memref<1x8x32xf32, #tpu.memory_space<vmem>>, vector<1x8x32xf32>
      %121 = vector.shape_cast %120 : vector<1x8x32xf32> to vector<8x32xf32>
      %c0_63 = arith.constant 0 : index
      %c0_64 = arith.constant 0 : index
      %122 = vector.load %arg4[%c0_63, %c0_64] : memref<8x32xf32, #tpu.memory_space<vmem>>, vector<8x32xf32>
      %123 = arith.addf %121, %122 : vector<8x32xf32>
      %c0_65 = arith.constant 0 : index
      %c0_66 = arith.constant 0 : index
      %124 = vector.load %arg5[%c0_65, %c0_66] : memref<1x32xf32, #tpu.memory_space<vmem>>, vector<1x32xf32>
      %c0_67 = arith.constant 0 : index
      %c0_68 = arith.constant 0 : index
      %125 = vector.load %arg6[%c0_67, %c0_68] : memref<1x32xf32, #tpu.memory_space<vmem>>, vector<1x32xf32>
      %cst_69 = arith.constant dense<0.000000e+00> : vector<8xf32>
      %126 = vector.multi_reduction <add>, %123, %cst_69 [1] : vector<8x32xf32> to vector<8xf32>
      %127 = vector.shape_cast %126 : vector<8xf32> to vector<8x1xf32>
      %cst_70 = arith.constant 3.200000e+01 : f32
      %128 = vector.broadcast %cst_70 : f32 to vector<8x1xf32>
      %129 = arith.divf %127, %128 : vector<8x1xf32>
      %130 = vector.broadcast %129 : vector<8x1xf32> to vector<8x32xf32>
      %131 = arith.subf %123, %130 : vector<8x32xf32>
      %132 = arith.mulf %131, %131 : vector<8x32xf32>
      %cst_71 = arith.constant dense<0.000000e+00> : vector<8xf32>
      %133 = vector.multi_reduction <add>, %132, %cst_71 [1] : vector<8x32xf32> to vector<8xf32>
      %134 = vector.shape_cast %133 : vector<8xf32> to vector<8x1xf32>
      %cst_72 = arith.constant 3.200000e+01 : f32
      %135 = vector.broadcast %cst_72 : f32 to vector<8x1xf32>
      %136 = arith.divf %134, %135 : vector<8x1xf32>
      %cst_73 = arith.constant 9.99999997E-7 : f32
      %137 = vector.broadcast %cst_73 : f32 to vector<8x1xf32>
      %138 = arith.addf %136, %137 : vector<8x1xf32>
      %139 = math.rsqrt %138 : vector<8x1xf32>
      %140 = vector.broadcast %139 : vector<8x1xf32> to vector<8x32xf32>
      %141 = arith.mulf %131, %140 : vector<8x32xf32>
      %142 = vector.broadcast %124 : vector<1x32xf32> to vector<8x32xf32>
      %143 = arith.mulf %141, %142 : vector<8x32xf32>
      %144 = vector.broadcast %125 : vector<1x32xf32> to vector<8x32xf32>
      %145 = arith.addf %143, %144 : vector<8x32xf32>
      %c0_74 = arith.constant 0 : index
      %c0_75 = arith.constant 0 : index
      %146 = vector.load %arg18[%c0_74, %c0_75] : memref<8x32xf32, #tpu.memory_space<vmem>>, vector<8x32xf32>
      tpu.vector_store %arg18[%c0_74, %c0_75], %145 {strides = array<i32>} : memref<8x32xf32, #tpu.memory_space<vmem>>, vector<8x32xf32>,
    } else {
    }
    %c0 = arith.constant 0 : index
    %c0_1 = arith.constant 0 : index
    %3 = vector.load %arg18[%c0, %c0_1] : memref<8x32xf32, #tpu.memory_space<vmem>>, vector<8x32xf32>
    %c0_2 = arith.constant 0 : index
    %c0_3 = arith.constant 0 : index
    %c0_4 = arith.constant 0 : index
    %4 = vector.load %arg3[%c0_2, %c0_3, %c0_4] : memref<1x1x8xf32, #tpu.memory_space<vmem>>, vector<1x1x8xf32>
    %5 = vector.shape_cast %4 : vector<1x1x8xf32> to vector<1x8xf32>
    %c0_5 = arith.constant 0 : index
    %c0_6 = arith.constant 0 : index
    %c0_7 = arith.constant 0 : index
    %6 = vector.load %arg7[%c0_5, %c0_6, %c0_7] : memref<1x32x96xf32, #tpu.memory_space<vmem>>, vector<1x32x96xf32>
    %7 = vector.shape_cast %6 : vector<1x32x96xf32> to vector<32x96xf32>
    %cst = arith.constant dense<0.000000e+00> : vector<8x96xf32>
    %8 = tpu.matmul %3, %7, %cst {dimension_numbers = #tpu.dot_dimension_numbers<[1], [0], [0], [1], [0, 0, 1, 1], [], []>} : vector<8x32xf32>, vector<32x96xf32>, vector<8x96xf32> -> vector<8x96xf32>
    %9 = vector.extract_strided_slice %8 {offsets = [0, 0], sizes = [8, 32], strides = [1, 1]} : vector<8x96xf32> to vector<8x32xf32>
    %10 = vector.extract_strided_slice %8 {offsets = [0, 32], sizes = [8, 32], strides = [1, 1]} : vector<8x96xf32> to vector<8x32xf32>
    %11 = vector.extract_strided_slice %8 {offsets = [0, 64], sizes = [8, 32], strides = [1, 1]} : vector<8x96xf32> to vector<8x32xf32>
    %12 = vector.extract_strided_slice %9 {offsets = [0, 0], sizes = [8, 16], strides = [1, 1]} : vector<8x32xf32> to vector<8x16xf32>
    %13 = vector.extract_strided_slice %10 {offsets = [0, 0], sizes = [8, 16], strides = [1, 1]} : vector<8x32xf32> to vector<8x16xf32>
    %14 = vector.extract_strided_slice %11 {offsets = [0, 0], sizes = [8, 16], strides = [1, 1]} : vector<8x32xf32> to vector<8x16xf32>
    %cst_8 = arith.constant dense<0.000000e+00> : vector<8x8xf32>
    %15 = tpu.matmul %12, %13, %cst_8 {dimension_numbers = #tpu.dot_dimension_numbers<[1], [1], [0], [0], [0, 0, 1, 0], [], []>} : vector<8x16xf32>, vector<8x16xf32>, vector<8x8xf32> -> vector<8x8xf32>
    %16 = vector.broadcast %5 : vector<1x8xf32> to vector<8x8xf32>
    %17 = arith.addf %15, %16 : vector<8x8xf32>
    %cst_9 = arith.constant dense<0xFF800000> : vector<8xf32>
    %18 = vector.multi_reduction <maximumf>, %17, %cst_9 [1] : vector<8x8xf32> to vector<8xf32>
    %19 = vector.shape_cast %18 : vector<8xf32> to vector<8x1xf32>
    %20 = vector.broadcast %19 : vector<8x1xf32> to vector<8x8xf32>
    %21 = arith.subf %17, %20 : vector<8x8xf32>
    %22 = math.exp %21 : vector<8x8xf32>
    %cst_10 = arith.constant dense<0.000000e+00> : vector<8xf32>
    %23 = vector.multi_reduction <add>, %22, %cst_10 [1] : vector<8x8xf32> to vector<8xf32>
    %24 = vector.shape_cast %23 : vector<8xf32> to vector<8x1xf32>
    %25 = tpu.reciprocal %24 : vector<8x1xf32> -> vector<8x1xf32>
    %26 = vector.broadcast %25 : vector<8x1xf32> to vector<8x8xf32>
    %27 = arith.mulf %22, %26 : vector<8x8xf32>
    %cst_11 = arith.constant dense<0.000000e+00> : vector<8x16xf32>
    %28 = tpu.matmul %27, %14, %cst_11 {dimension_numbers = #tpu.dot_dimension_numbers<[1], [0], [0], [1], [0, 0, 1, 1], [], []>} : vector<8x8xf32>, vector<8x16xf32>, vector<8x16xf32> -> vector<8x16xf32>
    %29 = vector.extract_strided_slice %9 {offsets = [0, 16], sizes = [8, 16], strides = [1, 1]} : vector<8x32xf32> to vector<8x16xf32>
    %30 = vector.extract_strided_slice %10 {offsets = [0, 16], sizes = [8, 16], strides = [1, 1]} : vector<8x32xf32> to vector<8x16xf32>
    %31 = vector.extract_strided_slice %11 {offsets = [0, 16], sizes = [8, 16], strides = [1, 1]} : vector<8x32xf32> to vector<8x16xf32>
    %cst_12 = arith.constant dense<0.000000e+00> : vector<8x8xf32>
    %32 = tpu.matmul %29, %30, %cst_12 {dimension_numbers = #tpu.dot_dimension_numbers<[1], [1], [0], [0], [0, 0, 1, 0], [], []>} : vector<8x16xf32>, vector<8x16xf32>, vector<8x8xf32> -> vector<8x8xf32>
    %33 = vector.broadcast %5 : vector<1x8xf32> to vector<8x8xf32>
    %34 = arith.addf %32, %33 : vector<8x8xf32>
    %cst_13 = arith.constant dense<0xFF800000> : vector<8xf32>
    %35 = vector.multi_reduction <maximumf>, %34, %cst_13 [1] : vector<8x8xf32> to vector<8xf32>
    %36 = vector.shape_cast %35 : vector<8xf32> to vector<8x1xf32>
    %37 = vector.broadcast %36 : vector<8x1xf32> to vector<8x8xf32>
    %38 = arith.subf %34, %37 : vector<8x8xf32>
    %39 = math.exp %38 : vector<8x8xf32>
    %cst_14 = arith.constant dense<0.000000e+00> : vector<8xf32>
    %40 = vector.multi_reduction <add>, %39, %cst_14 [1] : vector<8x8xf32> to vector<8xf32>
    %41 = vector.shape_cast %40 : vector<8xf32> to vector<8x1xf32>
    %42 = tpu.reciprocal %41 : vector<8x1xf32> -> vector<8x1xf32>
    %43 = vector.broadcast %42 : vector<8x1xf32> to vector<8x8xf32>
    %44 = arith.mulf %39, %43 : vector<8x8xf32>
    %cst_15 = arith.constant dense<0.000000e+00> : vector<8x16xf32>
    %45 = tpu.matmul %44, %31, %cst_15 {dimension_numbers = #tpu.dot_dimension_numbers<[1], [0], [0], [1], [0, 0, 1, 1], [], []>} : vector<8x8xf32>, vector<8x16xf32>, vector<8x16xf32> -> vector<8x16xf32>
    %46 = tpu.concatenate %28, %45 in 1 : vector<8x16xf32>, vector<8x16xf32> -> vector<8x32xf32>
    %c0_16 = arith.constant 0 : index
    %c0_17 = arith.constant 0 : index
    %c0_18 = arith.constant 0 : index
    %47 = vector.load %arg8[%c0_16, %c0_17, %c0_18] : memref<1x32x32xf32, #tpu.memory_space<vmem>>, vector<1x32x32xf32>
    %48 = vector.shape_cast %47 : vector<1x32x32xf32> to vector<32x32xf32>
    %cst_19 = arith.constant dense<0.000000e+00> : vector<8x32xf32>
    %49 = tpu.matmul %46, %48, %cst_19 {dimension_numbers = #tpu.dot_dimension_numbers<[1], [0], [0], [1], [0, 0, 1, 1], [], []>} : vector<8x32xf32>, vector<32x32xf32>, vector<8x32xf32> -> vector<8x32xf32>
    %50 = arith.addf %49, %3 : vector<8x32xf32>
    %c0_20 = arith.constant 0 : index
    %c0_21 = arith.constant 0 : index
    %c0_22 = arith.constant 0 : index
    %51 = vector.load %arg9[%c0_20, %c0_21, %c0_22] : memref<1x1x32xf32, #tpu.memory_space<vmem>>, vector<1x1x32xf32>
    %52 = vector.shape_cast %51 : vector<1x1x32xf32> to vector<1x32xf32>
    %c0_23 = arith.constant 0 : index
    %c0_24 = arith.constant 0 : index
    %c0_25 = arith.constant 0 : index
    %53 = vector.load %arg10[%c0_23, %c0_24, %c0_25] : memref<1x1x32xf32, #tpu.memory_space<vmem>>, vector<1x1x32xf32>
    %54 = vector.shape_cast %53 : vector<1x1x32xf32> to vector<1x32xf32>
    %cst_26 = arith.constant dense<0.000000e+00> : vector<8xf32>
    %55 = vector.multi_reduction <add>, %50, %cst_26 [1] : vector<8x32xf32> to vector<8xf32>
    %56 = vector.shape_cast %55 : vector<8xf32> to vector<8x1xf32>
    %cst_27 = arith.constant 3.200000e+01 : f32
    %57 = vector.broadcast %cst_27 : f32 to vector<8x1xf32>
    %58 = arith.divf %56, %57 : vector<8x1xf32>
    %59 = vector.broadcast %58 : vector<8x1xf32> to vector<8x32xf32>
    %60 = arith.subf %50, %59 : vector<8x32xf32>
    %61 = arith.mulf %60, %60 : vector<8x32xf32>
    %cst_28 = arith.constant dense<0.000000e+00> : vector<8xf32>
    %62 = vector.multi_reduction <add>, %61, %cst_28 [1] : vector<8x32xf32> to vector<8xf32>
    %63 = vector.shape_cast %62 : vector<8xf32> to vector<8x1xf32>
    %cst_29 = arith.constant 3.200000e+01 : f32
    %64 = vector.broadcast %cst_29 : f32 to vector<8x1xf32>
    %65 = arith.divf %63, %64 : vector<8x1xf32>
    %cst_30 = arith.constant 9.99999997E-7 : f32
    %66 = vector.broadcast %cst_30 : f32 to vector<8x1xf32>
    %67 = arith.addf %65, %66 : vector<8x1xf32>
    %68 = math.rsqrt %67 : vector<8x1xf32>
    %69 = vector.broadcast %68 : vector<8x1xf32> to vector<8x32xf32>
    %70 = arith.mulf %60, %69 : vector<8x32xf32>
    %71 = vector.broadcast %52 : vector<1x32xf32> to vector<8x32xf32>
    %72 = arith.mulf %70, %71 : vector<8x32xf32>
    %73 = vector.broadcast %54 : vector<1x32xf32> to vector<8x32xf32>
    %74 = arith.addf %72, %73 : vector<8x32xf32>
    %c0_31 = arith.constant 0 : index
    %c0_32 = arith.constant 0 : index
    %c0_33 = arith.constant 0 : index
    %75 = vector.load %arg11[%c0_31, %c0_32, %c0_33] : memref<1x32x64xf32, #tpu.memory_space<vmem>>, vector<1x32x64xf32>
    %76 = vector.shape_cast %75 : vector<1x32x64xf32> to vector<32x64xf32>
    %cst_34 = arith.constant dense<0.000000e+00> : vector<8x64xf32>
    %77 = tpu.matmul %74, %76, %cst_34 {dimension_numbers = #tpu.dot_dimension_numbers<[1], [0], [0], [1], [0, 0, 1, 1], [], []>} : vector<8x32xf32>, vector<32x64xf32>, vector<8x64xf32> -> vector<8x64xf32>
    %c0_35 = arith.constant 0 : index
    %c0_36 = arith.constant 0 : index
    %c0_37 = arith.constant 0 : index
    %78 = vector.load %arg12[%c0_35, %c0_36, %c0_37] : memref<1x1x64xf32, #tpu.memory_space<vmem>>, vector<1x1x64xf32>
    %79 = vector.shape_cast %78 : vector<1x1x64xf32> to vector<1x64xf32>
    %80 = vector.broadcast %79 : vector<1x64xf32> to vector<8x64xf32>
    %81 = arith.addf %77, %80 : vector<8x64xf32>
    %cst_38 = arith.constant 0.000000e+00 : f32
    %82 = vector.broadcast %cst_38 : f32 to vector<8x64xf32>
    %83 = arith.maximumf %81, %82 : vector<8x64xf32>
    %c0_39 = arith.constant 0 : index
    %c0_40 = arith.constant 0 : index
    %c0_41 = arith.constant 0 : index
    %84 = vector.load %arg13[%c0_39, %c0_40, %c0_41] : memref<1x64x32xf32, #tpu.memory_space<vmem>>, vector<1x64x32xf32>
    %85 = vector.shape_cast %84 : vector<1x64x32xf32> to vector<64x32xf32>
    %cst_42 = arith.constant dense<0.000000e+00> : vector<8x32xf32>
    %86 = tpu.matmul %83, %85, %cst_42 {dimension_numbers = #tpu.dot_dimension_numbers<[1], [0], [0], [1], [0, 0, 1, 1], [], []>} : vector<8x64xf32>, vector<64x32xf32>, vector<8x32xf32> -> vector<8x32xf32>
    %c0_43 = arith.constant 0 : index
    %c0_44 = arith.constant 0 : index
    %c0_45 = arith.constant 0 : index
    %87 = vector.load %arg14[%c0_43, %c0_44, %c0_45] : memref<1x1x32xf32, #tpu.memory_space<vmem>>, vector<1x1x32xf32>
    %88 = vector.shape_cast %87 : vector<1x1x32xf32> to vector<1x32xf32>
    %89 = vector.broadcast %88 : vector<1x32xf32> to vector<8x32xf32>
    %90 = arith.addf %86, %89 : vector<8x32xf32>
    %91 = arith.addf %90, %74 : vector<8x32xf32>
    %c0_46 = arith.constant 0 : index
    %c0_47 = arith.constant 0 : index
    %c0_48 = arith.constant 0 : index
    %92 = vector.load %arg15[%c0_46, %c0_47, %c0_48] : memref<1x1x32xf32, #tpu.memory_space<vmem>>, vector<1x1x32xf32>
    %93 = vector.shape_cast %92 : vector<1x1x32xf32> to vector<1x32xf32>
    %c0_49 = arith.constant 0 : index
    %c0_50 = arith.constant 0 : index
    %c0_51 = arith.constant 0 : index
    %94 = vector.load %arg16[%c0_49, %c0_50, %c0_51] : memref<1x1x32xf32, #tpu.memory_space<vmem>>, vector<1x1x32xf32>
    %95 = vector.shape_cast %94 : vector<1x1x32xf32> to vector<1x32xf32>
    %cst_52 = arith.constant dense<0.000000e+00> : vector<8xf32>
    %96 = vector.multi_reduction <add>, %91, %cst_52 [1] : vector<8x32xf32> to vector<8xf32>
    %97 = vector.shape_cast %96 : vector<8xf32> to vector<8x1xf32>
    %cst_53 = arith.constant 3.200000e+01 : f32
    %98 = vector.broadcast %cst_53 : f32 to vector<8x1xf32>
    %99 = arith.divf %97, %98 : vector<8x1xf32>
    %100 = vector.broadcast %99 : vector<8x1xf32> to vector<8x32xf32>
    %101 = arith.subf %91, %100 : vector<8x32xf32>
    %102 = arith.mulf %101, %101 : vector<8x32xf32>
    %cst_54 = arith.constant dense<0.000000e+00> : vector<8xf32>
    %103 = vector.multi_reduction <add>, %102, %cst_54 [1] : vector<8x32xf32> to vector<8xf32>
    %104 = vector.shape_cast %103 : vector<8xf32> to vector<8x1xf32>
    %cst_55 = arith.constant 3.200000e+01 : f32
    %105 = vector.broadcast %cst_55 : f32 to vector<8x1xf32>
    %106 = arith.divf %104, %105 : vector<8x1xf32>
    %cst_56 = arith.constant 9.99999997E-7 : f32
    %107 = vector.broadcast %cst_56 : f32 to vector<8x1xf32>
    %108 = arith.addf %106, %107 : vector<8x1xf32>
    %109 = math.rsqrt %108 : vector<8x1xf32>
    %110 = vector.broadcast %109 : vector<8x1xf32> to vector<8x32xf32>
    %111 = arith.mulf %101, %110 : vector<8x32xf32>
    %112 = vector.broadcast %93 : vector<1x32xf32> to vector<8x32xf32>
    %113 = arith.mulf %111, %112 : vector<8x32xf32>
    %114 = vector.broadcast %95 : vector<1x32xf32> to vector<8x32xf32>
    %115 = arith.addf %113, %114 : vector<8x32xf32>
    %c0_57 = arith.constant 0 : index
    %c0_58 = arith.constant 0 : index
    %116 = vector.load %arg18[%c0_57, %c0_58] : memref<8x32xf32, #tpu.memory_space<vmem>>, vector<8x32xf32>
    tpu.vector_store %arg18[%c0_57, %c0_58], %115 {strides = array<i32>} : memref<8x32xf32, #tpu.memory_space<vmem>>, vector<8x32xf32>,
    %c1_i32 = arith.constant 1 : i32
    %117 = arith.cmpi eq, %arg1, %c1_i32 : i32
    %118 = arith.extui %117 : i1 to i32
    %c0_i32_59 = arith.constant 0 : i32
    %119 = arith.cmpi ne, %118, %c0_i32_59 : i32
    scf.if %119 {
      %c0_60 = arith.constant 0 : index
      %c0_61 = arith.constant 0 : index
      %c0_62 = arith.constant 0 : index
      %120 = vector.load %arg17[%c0_60, %c0_61, %c0_62] : memref<1x8x32xf32, #tpu.memory_space<vmem>>, vector<1x8x32xf32>
      %121 = vector.shape_cast %120 : vector<1x8x32xf32> to vector<8x32xf32>
      %122 = vector.shape_cast %115 : vector<8x32xf32> to vector<1x8x32xf32>
      tpu.vector_store %arg17[%c0_60, %c0_61, %c0_62], %122 {strides = array<i32>} : memref<1x8x32xf32, #tpu.memory_space<vmem>>, vector<1x8x32xf32>,
    } else {
    }
    return
  }
  func.func @transform_0(%arg0: i32, %arg1: i32) -> (i32, i32, i32) {
    %c0_i32 = arith.constant 0 : i32
    %c0_i32_0 = arith.constant 0 : i32
    %c0_i32_1 = arith.constant 0 : i32
    return %arg0, %c0_i32, %c0_i32_0 : i32, i32, i32
  }
  func.func @transform_1(%arg0: i32, %arg1: i32) -> (i32, i32, i32) {
    %c0_i32 = arith.constant 0 : i32
    %c0_i32_0 = arith.constant 0 : i32
    %c0_i32_1 = arith.constant 0 : i32
    return %arg0, %c0_i32, %c0_i32_0 : i32, i32, i32
  }
  func.func @transform_2(%arg0: i32, %arg1: i32) -> (i32, i32) {
    %c0_i32 = arith.constant 0 : i32
    %c0_i32_0 = arith.constant 0 : i32
    %c0_i32_1 = arith.constant 0 : i32
    return %c0_i32, %c0_i32_0 : i32, i32
  }
  func.func @transform_3(%arg0: i32, %arg1: i32) -> (i32, i32) {
    %c0_i32 = arith.constant 0 : i32
    %c0_i32_0 = arith.constant 0 : i32
    %c0_i32_1 = arith.constant 0 : i32
    return %c0_i32, %c0_i32_0 : i32, i32
  }
  func.func @transform_4(%arg0: i32, %arg1: i32) -> (i32, i32) {
    %c0_i32 = arith.constant 0 : i32
    %c0_i32_0 = arith.constant 0 : i32
    %c0_i32_1 = arith.constant 0 : i32
    return %c0_i32, %c0_i32_0 : i32, i32
  }
  func.func @transform_5(%arg0: i32, %arg1: i32) -> (i32, i32, i32) {
    %c0_i32 = arith.constant 0 : i32
    %c0_i32_0 = arith.constant 0 : i32
    %c0_i32_1 = arith.constant 0 : i32
    return %arg1, %c0_i32, %c0_i32_0 : i32, i32, i32
  }
  func.func @transform_6(%arg0: i32, %arg1: i32) -> (i32, i32, i32) {
    %c0_i32 = arith.constant 0 : i32
    %c0_i32_0 = arith.constant 0 : i32
    %c0_i32_1 = arith.constant 0 : i32
    return %arg1, %c0_i32, %c0_i32_0 : i32, i32, i32
  }
  func.func @transform_7(%arg0: i32, %arg1: i32) -> (i32, i32, i32) {
    %c0_i32 = arith.constant 0 : i32
    %c0_i32_0 = arith.constant 0 : i32
    %c0_i32_1 = arith.constant 0 : i32
    return %arg1, %c0_i32, %c0_i32_0 : i32, i32, i32
  }
  func.func @transform_8(%arg0: i32, %arg1: i32) -> (i32, i32, i32) {
    %c0_i32 = arith.constant 0 : i32
    %c0_i32_0 = arith.constant 0 : i32
    %c0_i32_1 = arith.constant 0 : i32
    return %arg1, %c0_i32, %c0_i32_0 : i32, i32, i32
  }
  func.func @transform_9(%arg0: i32, %arg1: i32) -> (i32, i32, i32) {
    %c0_i32 = arith.constant 0 : i32
    %c0_i32_0 = arith.constant 0 : i32
    %c0_i32_1 = arith.constant 0 : i32
    return %arg1, %c0_i32, %c0_i32_0 : i32, i32, i32
  }
  func.func @transform_10(%arg0: i32, %arg1: i32) -> (i32, i32, i32) {
    %c0_i32 = arith.constant 0 : i32
    %c0_i32_0 = arith.constant 0 : i32
    %c0_i32_1 = arith.constant 0 : i32
    return %arg1, %c0_i32, %c0_i32_0 : i32, i32, i32
  }
  func.func @transform_11(%arg0: i32, %arg1: i32) -> (i32, i32, i32) {
    %c0_i32 = arith.constant 0 : i32
    %c0_i32_0 = arith.constant 0 : i32
    %c0_i32_1 = arith.constant 0 : i32
    return %arg1, %c0_i32, %c0_i32_0 : i32, i32, i32
  }
  func.func @transform_12(%arg0: i32, %arg1: i32) -> (i32, i32, i32) {
    %c0_i32 = arith.constant 0 : i32
    %c0_i32_0 = arith.constant 0 : i32
    %c0_i32_1 = arith.constant 0 : i32
    return %arg1, %c0_i32, %c0_i32_0 : i32, i32, i32
  }
  func.func @transform_13(%arg0: i32, %arg1: i32) -> (i32, i32, i32) {
    %c0_i32 = arith.constant 0 : i32
    %c0_i32_0 = arith.constant 0 : i32
    %c0_i32_1 = arith.constant 0 : i32
    return %arg1, %c0_i32, %c0_i32_0 : i32, i32, i32
  }
  func.func @transform_14(%arg0: i32, %arg1: i32) -> (i32, i32, i32) {
    %c0_i32 = arith.constant 0 : i32
    %c0_i32_0 = arith.constant 0 : i32
    %c0_i32_1 = arith.constant 0 : i32
    return %arg1, %c0_i32, %c0_i32_0 : i32, i32, i32
  }
  func.func @transform_15(%arg0: i32, %arg1: i32) -> (i32, i32, i32) {
    %c0_i32 = arith.constant 0 : i32
    %c0_i32_0 = arith.constant 0 : i32
    %c0_i32_1 = arith.constant 0 : i32
    return %arg0, %c0_i32, %c0_i32_0 : i32, i32, i32
  }
}

</mosaic_0001>

<bundles_post_ra>
// kernel: tpu_custom_call.1
= control target key start
LH: loop header
LB: loop body
LE: loop exit
PB: predicated region body
PF: predicated region fallthrough
CT: control target
= control target key end

     0   :  { %s2473_s0 = inlined_call_operand.hbm [shape: f32[2,8,32], index: 0, kind: input, shape index: {}]   ;;  %s2474_s1 = inlined_call_operand.hbm [shape: f32[2,1,8], index: 1, kind: input, shape index: {}]   ;;  %s2475_s2 = inlined_call_operand.hbm [shape: f32[8,32], index: 2, kind: input, shape index: {}]   ;;  %s2476_s3 = inlined_call_operand.hbm [shape: f32[1,32], index: 3, kind: input, shape index: {}]   ;;  %s2477_s4 = inlined_call_operand.hbm [shape: f32[1,32], index: 4, kind: input, shape index: {}]   ;;  %s2478_s5 = inlined_call_operand.vmem [shape: f32[2,32,96], index: 5, kind: input, shape index: {}]   ;;  %s2479_s6 = inlined_call_operand.vmem [shape: f32[2,32,32], index: 6, kind: input, shape index: {}]   ;;  %s2480_s7 = inlined_call_operand.vmem [shape: f32[2,1,32], index: 7, kind: input, shape index: {}]   ;;  %s2481_s8 = inlined_call_operand.vmem [shape: f32[2,1,32], index: 8, kind: input, shape index: {}]   ;;  %s2482_s9 = inlined_call_operand.vmem [shape: f32[2,32,64], index: 9, kind: input, shape index: {}]   ;;  %s2483_s10 = inlined_call_operand.vmem [shape: f32[2,1,64], index: 10, kind: input, shape index: {}]   ;;  %s2484_s11 = inlined_call_operand.vmem [shape: f32[2,64,32], index: 11, kind: input, shape index: {}]   ;;  %s2485_s12 = inlined_call_operand.vmem [shape: f32[2,1,32], index: 12, kind: input, shape index: {}]   ;;  %s2486_s13 = inlined_call_operand.vmem [shape: f32[2,1,32], index: 13, kind: input, shape index: {}]   ;;  %s2487_s14 = inlined_call_operand.hbm [shape: f32[2,1,32], index: 14, kind: input, shape index: {}]   ;;  %s2488_s15 = inlined_call_operand.hbm [shape: f32[2,8,32], index: 15, kind: output, shape index: {}]  }
   0x1   :  { %2502 = sst [smem:[#allocation34_spill]] %s2473_s0 }
   0x2   :  { %2503 = sst [smem:[#allocation35_spill]] %s2474_s1 }
   0x3   :  { %2504 = sst [smem:[#allocation36_spill]] %s2475_s2 }
   0x4   :  { %2505 = sst [smem:[#allocation37_spill]] %s2476_s3 }
   0x5   :  { %2506 = sst [smem:[#allocation38_spill]] %s2477_s4 }
   0x6   :  { %2507 = sst [smem:[#allocation39_spill]] %s2478_s5 }
   0x7   :  { %2508 = sst [smem:[#allocation40_spill]] %s2479_s6 }
   0x8   :  { %2509 = sst [smem:[#allocation41_spill]] %s2481_s8 }
   0x9   :  { %2510 = sst [smem:[#allocation42_spill]] %s2482_s9 }
   0xa   :  { %2511 = sst [smem:[#allocation43_spill]] %s2483_s10 }
   0xb   :  { %2512 = sst [smem:[#allocation44_spill]] %s2484_s11 }
   0xc   :  { %2513 = sst [smem:[#allocation45_spill]] %s2485_s12 }
   0xd   :  { %2514 = sst [smem:[#allocation46_spill]] %s2486_s13 }
   0xe   :  { %2515 = sst [smem:[#allocation47_spill]] %s2487_s14 }
   0xf   :  { %2516 = sst [smem:[#allocation48_spill]] %s2488_s15 }
  0x10   :  { %20 = vsyncpa [#allocation4], 0 }
  0x11   :  { %22 = vsyncpa [#allocation4 + $0x1], 0 }
  0x12   :  { %23 = vsyncpa [#allocation7], 0 }
  0x13   :  { %25 = vsyncpa [#allocation7 + $0x1], 0 }
  0x14   :  { %26 = vsyncpa [#allocation10], 0 }
  0x15   :  { %27 = vsyncpa [#allocation13], 0 }
  0x16   :  { %29 = vsyncpa [#allocation13 + $0x1], 0 }
  0x17   :  { %30 = vsyncpa [#allocation5], 0 }
  0x18   :  { %32 = vsyncpa [#allocation5 + $0x1], 0  ;;  %s2091_s18 = smov 0   ;;  %s2093_s19 = smov 0  }
  0x19   :  { %s2095_s20 = smov 0   ;;  %s2097_s21 = smov 0  }
  0x1a   :  { %s2099_s22 = smov 0   ;;  %s2101_s23 = smov 0  }
  0x1b   :  { %s2103_s24 = smov 0   ;;  %s2105_s25 = smov 0  }
  0x1c   :  { %s2107_s26 = smov 0   ;;  %s2109_s27 = smov 0  }
  0x1d   :  { %s2111_s28 = smov 0  }
  0x1e LB: > { %2517 = sst [smem:[#allocation21_spill]] %s1966_s20  ;;  %s2147_s29 = sadd.s32 4294967295, %s1998_s28   ;;  %s1998_s28 = sphi %s2111_s28, %s38_s28   ;;  %s1994_s27 = sphi %s2109_s27, %s2572_s27   ;;  %s1990_s26 = sphi %s2107_s26, %s2571_s26   ;;  %s1986_s25 = sphi %s2105_s25, %s2570_s25   ;;  %s1982_s24 = sphi %s2103_s24, %s2569_s24   ;;  %s1978_s23 = sphi %s2101_s23, %s2568_s23   ;;  %s1974_s22 = sphi %s2099_s22, %s2567_s22   ;;  %s1970_s21 = sphi %s2097_s21, %s2566_s21   ;;  %s1966_s20 = sphi %s2095_s20, %s2565_s20   ;;  %s1962_s19 = sphi %s2093_s19, %s2574_s19   ;;  %s1958_s18 = sphi %s2091_s18, %s2573_s18  }
  0x1f   : > { %2518 = sst [smem:[#allocation22_spill]] %s1970_s21  ;;  %p1461_p0 = scmp.ge.s32.totalorder %s1998_s28, 1 }
  0x20   : > { %2519 = sst [smem:[#allocation23_spill]] %s1974_s22  ;;  %p71_p1 = scmp.eq.s32.totalorder %s2147_s29, 0 }
  0x21   : > { %2520 = sst [smem:[#allocation24_spill]] %s1978_s23  ;;  %p456_p2 = scmp.lt.s32.totalorder %s1998_s28, 5 }
  0x22   : > { %2521 = sst [smem:[#allocation25_spill]] %s1986_s25  ;;  %s2000_s25 = smov [#allocation8]  }
  0x23   : > { %2522 = sst [smem:[#allocation26_spill]] %s1990_s26  ;;  %p2155_p3 = pnand %p1461_p0, %p456_p2 }
  0x24   : > { %2523 = sst [smem:[#allocation27_spill]] %s1994_s27  ;;  %s470_s13 = sshll.u32 %s2000_s25, 4  ;;  %s471_s13 = int_to_ptr.vmem [resolvable:$true] %s470_s13 }
  0x25   : > { %s2524_s2 = sld [smem:[#allocation36_spill]]  ;;  %p1522_p4 = pneg %p2155_p3 }
  0x26   : > { %s2526_s3 = sld [smem:[#allocation37_spill]]  ;;  %s2001_s25 = smov [#allocation9]  }
  0x27   : > { %p1523_p5 = pnand %p1522_p4, %p71_p1  ;;  %s2527_s4 = sld [smem:[#allocation38_spill]] }
  0x28   : > { %s482_s9 = sshll.u32 %s2001_s25, 4  ;;  %s2002_s11 = smov [#allocation11]   ;;  %s483_s9 = int_to_ptr.vmem [resolvable:$true] %s482_s9 }
  0x29   : > { %s494_s12 = sshll.u32 %s2002_s11, 4  ;;  %p64_p6 = scmp.ne.s32.totalorder %s1978_s23, %s1974_s22  ;;  %s495_s12 = int_to_ptr.vmem [resolvable:$true] %s494_s12 }
  0x2a   : > { %p65_p7 = scmp.eq.s32.totalorder %s1998_s28, 0  ;;  %p70_p8 = scmp.ne.s32.totalorder %s1974_s22, %s1970_s21 }
  0x2b   : > { %s468_s17 = sshll.u32 %s2524_s2, 4  ;;  %p443_p9 = scmp.eq.s32.totalorder %s2147_s29, 3  ;;  %s469_s17 = int_to_ptr.hbm [resolvable:$true] %s468_s17 }
  0x2c   : > { %s480_s10 = sshll.u32 %s2526_s3, 4  ;;  %s1460_s3 = sadd.s32 4294967294, %s1998_s28   ;;  %s481_s10 = int_to_ptr.hbm [resolvable:$true] %s480_s10 }
  0x2d   : > { %s492_s2 = sshll.u32 %s2527_s4, 4  ;;  %p449_p10 = scmp.eq.s32.totalorder %s1460_s3, 3  ;;  %s493_s2 = int_to_ptr.hbm [resolvable:$true] %s492_s2 }
  0x2e   : > { %1525 = dma.hbm_to_vmem [thread:$0]  (!%p1523_p5), %s469_s17, 128, %s471_s13, [#allocation7]  }
  0x2f   : > { %1528 = dma.hbm_to_vmem [thread:$0]  (!%p1523_p5), %s481_s10, 16, %s483_s9, [#allocation10]  }
  0x30   : > { %1531 = dma.hbm_to_vmem [thread:$0]  (!%p1523_p5), %s493_s2, 16, %s495_s12, [#allocation10]  }
  0x31   : > { %p2178_p11 = por %p65_p7, %p64_p6  ;;  %p2184_p12 = por %p71_p1, %p70_p8 }
  0x32   : > { %p2188_p13 = por %p443_p9, %p64_p6  ;;  %p2192_p0 = por %p449_p10, %p70_p8 }
  0x33   : > { %p1549_p2 = scmp.lt.s32.totalorder %s1998_s28, 4  ;;  %s505_s3 = sand.u32 1, %s1978_s23  }
  0x34   : > { %s2530_s2 = scalar_select %p2188_p13, 1, 0 }
  0x35   : > { %s2532_s10 = scalar_select %p2192_p0, 1, 0 }
  0x36   : > { %2531 = sst [smem:[#allocation28_spill]] %s2530_s2  ;;  %s1466_s17 = sshll.u32 %s505_s3, 3 }
  0x37   : > { %2533 = sst [smem:[#allocation29_spill]] %s2532_s10  ;;  %s1467_s30 = sshll.u32 %s1994_s27, 3 }
  0x38   : > { %s2534_s0 = sld [smem:[#allocation34_spill]]  ;;  %s509_s12 = scalar_lea.vmem [#allocation3], %s1466_s17 }
  0x39   : > { %s517_s4 = sshll.u32 %s509_s12, 4  ;;  %p1533_p4 = pnand %p1549_p2, %p2178_p11  ;;  %s518_s4 = int_to_ptr.vmem [resolvable:$true] %s517_s4 }
  0x3a   : > { %s524_s10 = sand.u32 1, %s1998_s28   ;;  %s506_s2 = scalar_lea.sflag [#allocation4], %s505_s3 }
  0x3b   : > { %s2535_s1 = sld [smem:[#allocation35_spill]]  ;;  %s527_s17 = scalar_lea.vmem [#allocation6], %s505_s3 }
  0x3c   : > { %s534_s16 = sshll.u32 %s527_s17, 4  ;;  %s57_s13 = sadd.s32 1, %s1978_s23  ;;  %s535_s16 = int_to_ptr.vmem [resolvable:$true] %s534_s16 }
  0x3d   : > { %s50_s6 = sadd.s32 1, %s1994_s27  ;;  %s406_s8 = sadd.s32 1, %s1966_s20 }
  0x3e   : > { %s513_s11 = scalar_lea.hbm %s2534_s0, %s1467_s30  ;;  %p413_p6 = scmp.ne.s32.totalorder %s1966_s20, %s1962_s19 }
  0x3f   : > { %s515_s21 = sshll.u32 %s513_s11, 4  ;;  %s525_s11 = scalar_lea.sflag [#allocation7], %s524_s10  ;;  %s516_s21 = int_to_ptr.hbm [resolvable:$true] %s515_s21 }
  0x40   : > { %1535 = dma.hbm_to_vmem [thread:$0]  (!%p1533_p4), %s516_s21, 128, %s518_s4, %s506_s2  }
  0x41   : > { %s530_s30 = scalar_lea.hbm %s2535_s1, %s1994_s27  ;;  %s47_s4 = sadd.s32 1, %s1990_s26 }
  0x42   : > { %s532_s25 = sshll.u32 %s530_s30, 4  ;;  %p48_p5 = scmp.ge.s32.totalorder %s47_s4, 2  ;;  %s533_s25 = int_to_ptr.hbm [resolvable:$true] %s532_s25 }
  0x43   : > { %1538 = dma.hbm_to_vmem [thread:$0]  (!%p1533_p4), %s533_s25, 16, %s535_s16, %s525_s11  }
  0x44   : > { %s2576_s4 = smov (%p48_p5, %s47_s4), 0  ;;  %s2578_s6 = smov (!%p48_p5, %s50_s6), %s1994_s27 }
  0x45   : > { %2536 = sst [smem:[#allocation30_spill]] %s2576_s4  ;;  %s403_s21 = ssub.s32 %s1990_s26, %s2576_s4 }
  0x46   : > { %p52_p8 = scmp.ge.s32.totalorder %s2578_s6, 2  ;;  %p404_p9 = scmp.eq.s32.totalorder %s403_s21, 0 }
  0x47   : > { %p419_p10 = scmp.ne.s32.totalorder %s1962_s19, %s1958_s18  ;;  %s603_s2 = sand.u32 1, %s1966_s20  }
  0x48   : > { %s2580_s6 = smov (%p52_p8, %s2578_s6), 0  ;;  %p415_p5 = por %p413_p6, %p65_p7 }
  0x49   : > { %2537 = sst [smem:[#allocation31_spill]] %s2580_s6  ;;  %s54_s3 = ssub.s32 %s1994_s27, %s2580_s6 }
  0x4a   : > { %s2228_s10 = scalar_select %p404_p9, %s1966_s20, %s406_s8  }
  0x4b   : > { %p2234_p11 = por %p419_p10, %p71_p1  ;;  %p55_p4 = scmp.eq.s32.totalorder %s54_s3, 0 }
  0x4c   : > { %2538 = sst [smem:[#allocation32_spill]] %s2228_s10  ;;  %s606_s11 = scalar_lea.vmem [#allocation12], %s603_s2 }
  0x4d   : > { %s2540_s14 = sld [smem:[#allocation47_spill]]  ;;  %s613_s21 = sshll.u32 %s606_s11, 4  ;;  %s614_s21 = int_to_ptr.vmem [resolvable:$true] %s613_s21 }
  0x4e   : > { %s2245_s18 = scalar_select %p55_p4, %s1978_s23, %s57_s13  }
  0x4f   : > { %p1539_p8 = pnand %p1549_p2, %p415_p5  ;;  %s604_s8 = scalar_lea.sflag [#allocation13], %s603_s2 }
  0x50   : > { %2541 = sst [smem:[#allocation33_spill]] %s2245_s18  ;;  %s2252_s3 = sand.u32 (!%p2155_p3), 1, %s1974_s22  }
  0x51   : > { %622 = sbr.rel (%p2155_p3) target bundleno = 2219 (0x8ab), region = 80  ;;  %s2494_s13 = sshll.u32 (!%p2155_p3), %s2252_s3, 3 }
  0x52   : > { %s625_s30 = scalar_lea.sflag (!%p2155_p3), [#allocation4], %s2252_s3  ;;  %s2258_s17 = scalar_lea.vmem (!%p2155_p3), [#allocation3], %s2494_s13 }
  0x53   : > { %s609_s16 = scalar_lea.hbm %s2540_s14, %s1990_s26 }
  0x54   : > { %s611_s25 = sshll.u32 %s609_s16, 4  ;;  %s612_s25 = int_to_ptr.hbm [resolvable:$true] %s611_s25 }
  0x55   : > { %1541 = dma.hbm_to_vmem [thread:$0]  (!%p1539_p8), %s612_s25, 16, %s614_s21, %s604_s8  }
  0x56   : > { %1933 = dma.done.wait (%p2184_p12), %s625_s30, 128  }
  0x57   : > { %1935 = vsyncadd (%p2184_p12), %s625_s30, 4294967168  ;;  %s634_s15 = sand.u32 1, %s2147_s29  }
  0x58   : > { %s635_s2 = scalar_lea.sflag [#allocation7], %s634_s15 }
  0x59   : > { %1937 = dma.done.wait (%p2184_p12), %s635_s2, 16  }
  0x5a   : > { %1939 = vsyncadd (%p2184_p12), %s635_s2, 4294967280 }
  0x5b   : > { %1941 = dma.done.wait (%p71_p1), [#allocation7], 128  }
  0x5c   : > { %1943 = vsyncadd (%p71_p1), [#allocation7], 4294967168 }
  0x5d   : > { %1945 = dma.done.wait (%p71_p1), [#allocation10], 32  }
  0x5e   : > { %1947 = vsyncadd (%p71_p1), [#allocation10], 4294967264  ;;  %s658_s25 = sand.u32 1, %s1962_s19  }
  0x5f   : > { %s659_s11 = scalar_lea.sflag [#allocation13], %s658_s25  ;;  %s2279_s21 = scalar_lea.vmem [#allocation12], %s658_s25 }
  0x60   : > { %1949 = dma.done.wait (%p2234_p11), %s659_s11, 16  }
  0x61   : > { %1951 = vsyncadd (%p2234_p11), %s659_s11, 4294967280  ;;  %p752_p3 = scmp.lt.s32.totalorder %s1982_s24, 1  ;;  %s2542_s5 = sld [smem:[#allocation39_spill]] }
  0x62   : > { %s2543_s13 = sld [smem:[#allocation40_spill]]  ;;  %s2550_s27 = sshll.u32 %s2252_s3, 3 }
  0x63   : > { %s2287_s9 = scalar_select %p752_p3, %s1982_s24, 1 }
  0x64   : > { %s2545_s18 = sld [smem:[#allocation42_spill]]  ;;  %p1482_p1 = scmp.ne.s32.totalorder %s1982_s24, 0 }
  0x65   : > { %s1498_s29 = sshll.u32 %s2287_s9, 5  ;;  %s2546_s15 = sld [smem:[#allocation43_spill]] }
  0x66   : > { %s1501_s2 = sshll.u32 %s2287_s9, 6  ;;  %s2547_s10 = sld [smem:[#allocation44_spill]] }
  0x67   : > { %s2297_s25 = scalar_lea.vmem %s2542_s5, %s1498_s29  ;;  %s2548_s20 = sld [smem:[#allocation45_spill]] }
  0x68   : > { %s2302_s0 = scalar_lea.vmem %s2543_s13, %s1498_s29  ;;  %s2549_s4 = sld [smem:[#allocation46_spill]] }
  0x6a   : > { %s2311_s23 = scalar_lea.vmem %s2545_s18, %s1498_s29  ;;  %s2333_s18 = scalar_lea.vmem [#allocation14], %s2550_s27 }
  0x6b   : > { %s775_s12 = scalar_lea.vmem %s2546_s15, %s2287_s9  ;;  %790 = sbr.rel (%p1482_p1) target bundleno = 384 (0x180), region = 108 }
  0x6c   : > { %s2321_s16 = scalar_lea.vmem %s2547_s10, %s1501_s2 }
  0x6d   : > { %s783_s1 = scalar_lea.vmem %s2548_s20, %s2287_s9 }
  0x6e   : > { %s786_s26 = scalar_lea.vmem %s2549_s4, %s2287_s9 }
  0x70   : > { %v791_v0 = vld [vmem:[%s2258_s17] sm:$0xff]  ;;  %v792_v1 = vld [vmem:[#allocation8] sm:$0xff]  ;;  %vm796_vm0 = vcmask 261120   ;;  %v2003_v4 = vmov 32.0   ;;  %v1653_v25 = vld [vmem:[#allocation9] ss:$0 sm:$0xff] }
  0x71   : > { %v793_v2 = vadd.f32 %v792_v1, %v791_v0  ;;  %1655 = vrcp.f32 %v2003_v4  ;;  %v1654_v27 = vld [vmem:[#allocation11] ss:$0 sm:$0xff] }
  0x73   : > { %v797_v3 = vsel %vm796_vm0, %v793_v2, 0.0 }
  0x74   : > { %798 = vadd.xlane.f32.xlu0 %v797_v3 }
  0x77   : > { %v1656_v5 = vpop.eup %1655 }
  0x78   : > { %v801_v6 = vmul.f32 32.0, %v1656_v5  ;;  %vm805_vm1 = vweird.f32 %v1656_v5 }
  0x7a   : > { %v802_v7 = vsub.f32 1.0, %v801_v6 }
  0x7c   : > { %v803_v8 = vmul.f32 %v1656_v5, %v802_v7 }
  0x7e   : > { %v804_v9 = vadd.f32 %v1656_v5, %v803_v8 }
  0x80   : > { %v806_v10 = vsel %vm805_vm1, %v1656_v5, %v804_v9 }
  0xe7   : > { %v799_v11 = vpop.xlane.xlu0 %798 }
  0xe8   : > { %v807_v12 = vmul.f32 %v806_v10, %v799_v11 }
  0xea   : > { %v808_v13 = vsub.f32 %v793_v2, %v807_v12 }
  0xec   : > { %v809_v14 = vmul.f32 %v808_v13, %v808_v13 }
  0xee   : > { %v810_v15 = vsel %vm796_vm0, %v809_v14, 0.0 }
  0xef   : > { %811 = vadd.xlane.f32.xlu0 %v810_v15 }
 0x162   : > { %v812_v16 = vpop.xlane.xlu0 %811 }
 0x163   : > { %v813_v17 = vmul.f32 %v812_v16, %v806_v10 }
 0x165   : > { %v814_v18 = vadd.f32 1e-06, %v813_v17 }
 0x167   : > { %1657 = vrsqrt.f32 %v814_v18  ;;  %vm821_vm3 = vweird.f32 %v814_v18 }
 0x16d   : > { %v1658_v19 = vpop.eup %1657 }
 0x16e   : > { %v816_v20 = vmul.f32 %v1658_v19, %v814_v18  ;;  %vm822_vm2 = vweird.f32 %v1658_v19 }
 0x16f   : > { %vm823_vm4 = vmor %vm821_vm3, %vm822_vm2 }
 0x170   : > { %v817_v21 = vmul.f32 %v1658_v19, %v816_v20 }
 0x172   : > { %v818_v22 = vmul.f32 0.5, %v817_v21 }
 0x174   : > { %v819_v23 = vsub.f32 1.5, %v818_v22 }
 0x176   : > { %v820_v24 = vmul.f32 %v1658_v19, %v819_v23 }
 0x178   : > { %v824_v26 = vsel %vm823_vm4, %v1658_v19, %v820_v24 }
 0x179   : > { %v825_v28 = vmul.f32 %v824_v26, %v808_v13 }
 0x17b   : > { %v829_v29 = vmul.f32 %v1653_v25, %v825_v28 }
 0x17d   : > { %v833_v30 = vadd.f32 %v1654_v27, %v829_v29 }
 0x17f   : > { %834 = vst.msk [vmem:[#allocation2] sm:$0xff] %vm796_vm0, %v833_v30 }
 0x180 PF: > { %v840_v31 = vld [vmem:[%s2297_s25 + $0x18] sm:$0xff]  ;;  %v839_v32 = vld [vmem:[%s2297_s25 + $0x10] sm:$0xff]  ;;  %v838_v33 = vld [vmem:[%s2297_s25 + $0x8] sm:$0xff]  ;;  %vm841_vm5 = vcmask 261120   ;;  %s2004_s5 = smov 112   ;;  %s2005_s20 = smov 96  }
 0x181   : > { %857 = vmatpush.msra.mxu0 %v840_v31  ;;  %v837_v34 = vld [vmem:[%s2297_s25] sm:$0xff]  ;;  %s2006_s22 = smov 80   ;;  %vm871_vm6 = vcmask 130048   ;;  %s2551_s4 = scalar_lea.vmem [#allocation6], %s2252_s3  ;;  %vm896_vm7 = vcmask 64512   ;;  %v1033_v19 = vld [vmem:[%s2302_s0 + $0x18] sm:$0xff] }
 0x182   : > { %v1659_v40 = vld [vmem:[%s2551_s4] ss:$0 sm:$0xff]  ;;  %s2007_s10 = smov 64   ;;  %s2008_s17 = smov 48   ;;  %v1032_v20 = vld [vmem:[%s2302_s0 + $0x10] sm:$0xff]  ;;  %v1031_v21 = vld [vmem:[%s2302_s0 + $0x8] sm:$0xff] }
 0x183   : > { %858 = vmatpush.msra.mxu0 %v839_v32  ;;  %v1030_v22 = vld [vmem:[%s2302_s0] sm:$0xff]  ;;  %s2009_s29 = smov 16   ;;  %v2010_v30 = vmov 32.0   ;;  %s2552_s15 = scalar_lea.vmem %s2480_s7, %s2287_s9  ;;  %vm1140_vm4 = vcmask 523264  }
 0x184   : > { %s2553_s30 = sld [smem:[#allocation41_spill]]  ;;  %p1493_p7 = scmp.ne.s32.totalorder %s1982_s24, 1 }
 0x185   : > { %859 = vmatpush.msra.mxu0 %v838_v33 }
 0x186   : > { %v2344_v35 = vld [vmem:[#allocation2] sm:$0xff] }
 0x187   : > { %860 = vmatpush.msra.mxu0 %v837_v34 }
 0x188   : > { %1483 = vmatmul.msk.f32.vlgmr.msra.gmra.mxu0 %vm841_vm5, %v2344_v35 }
 0x18a   : > { %s2554_s2 = scalar_lea.vmem %s2553_s30, %s2287_s9 }
 0x205   : > { %v862_v36 = vpop.f32.mrf.mxu0 }
 0x206   : > { %947 = vrot.lane.b32.xlu1 %v862_v36, %s2004_s5  ;;  %869 = vrot.lane.b32.xlu0 %v862_v36, %s2005_s20 }
 0x20e   : > { %949 = vrot.lane.b32.xlu0 %v862_v36, %s2006_s22 }
 0x278   : > { %v870_v37 = vpop.permute.xlu0 %869  ;;  %v948_v39 = vpop.permute.xlu1 %947 }
 0x279   : > { %1484 = vmatpush.xpose.msk.msra.mxu1 %vm871_vm6, %v870_v37 }
 0x27c   : > { %1485 = vmatmul.msk.f32.vlgmr.msra.gmra.mxu1 %vm871_vm6, %v862_v36 }
 0x27d   : > { %1049 = vmatpush.msrb.mxu1 %v1033_v19 }
 0x27f   : > { %1050 = vmatpush.msrb.mxu1 %v1032_v20 }
 0x280   : > { %v950_v38 = vpop.permute.xlu0 %949 }
 0x281   : > { %1487 = vmatpush.xpose.msk.msra.mxu3 %vm871_vm6, %v950_v38  ;;  %1051 = vmatpush.msrb.mxu1 %v1031_v21 }
 0x283   : > { %1052 = vmatpush.msrb.mxu1 %v1030_v22 }
 0x284   : > { %1488 = vmatmul.msk.f32.vlgmr.msra.gmra.mxu3 %vm871_vm6, %v948_v39 }
 0x2f9   : > { %v893_v41 = vpop.f32.mrf.mxu1 }
 0x2fa   : > { %v894_v42 = vadd.f32 %v1659_v40, %v893_v41 }
 0x2fc   : > { %v897_v43 = vsel %vm896_vm7, %v894_v42, -inf }
 0x2fd   : > { %898 = vmax.xlane.f32.xlu1 %v897_v43  ;;  %v1098_v43 = vld [vmem:[%s2311_s23 + $0x10] sm:$0xff] }
 0x307   : > { %v972_v44 = vpop.f32.mrf.mxu3 }
 0x308   : > { %v973_v45 = vadd.f32 %v1659_v40, %v972_v44  ;;  %v1097_v44 = vld [vmem:[%s2311_s23 + $0x8] sm:$0xff] }
 0x30a   : > { %v975_v46 = vsel %vm896_vm7, %v973_v45, -inf }
 0x30b   : > { %976 = vmax.xlane.f32.xlu2 %v975_v46  ;;  %v1135_v46 = vld [vmem:[%s2321_s16 + $0x38] sm:$0xff] }
 0x30c   : > { %1152 = vmatpush.msrb.mxu0 %v1135_v46 }
 0x370   : > { %v899_v47 = vpop.xlane.xlu1 %898 }
 0x371   : > { %v900_v48 = vsub.f32 %v894_v42, %v899_v47  ;;  %v1099_v42 = vld [vmem:[%s2311_s23 + $0x18] sm:$0xff]  ;;  %v1134_v47 = vld [vmem:[%s2321_s16 + $0x30] sm:$0xff] }
 0x372   : > { %1119 = vmatpush.msrb.mxu3 %v1099_v42  ;;  %1153 = vmatpush.msrb.mxu0 %v1134_v47 }
 0x373   : > { %v901_v49 = vmul.f32 1.442695, %v900_v48  ;;  %v1133_v48 = vld [vmem:[%s2321_s16 + $0x28] sm:$0xff] }
 0x374   : > { %1120 = vmatpush.msrb.mxu3 %v1098_v43  ;;  %1154 = vmatpush.msrb.mxu0 %v1133_v48 }
 0x375   : > { %1666 = vpow2.f32 %v901_v49 }
 0x376   : > { %1121 = vmatpush.msrb.mxu3 %v1097_v44 }
 0x37b   : > { %v1667_v50 = vpop.eup %1666 }
 0x37c   : > { %v903_v51 = vsel %vm896_vm7, %v1667_v50, 0.0 }
 0x37d   : > { %904 = vadd.xlane.f32.xlu2 %v903_v51  ;;  %v1132_v51 = vld [vmem:[%s2321_s16 + $0x20] sm:$0xff] }
 0x37e   : > { %v977_v52 = vpop.xlane.xlu2 %976  ;;  %1155 = vmatpush.msrb.mxu0 %v1132_v51 }
 0x37f   : > { %v978_v53 = vsub.f32 %v973_v45, %v977_v52  ;;  %v1096_v45 = vld [vmem:[%s2311_s23] sm:$0xff] }
 0x380   : > { %1122 = vmatpush.msrb.mxu3 %v1096_v45 }
 0x381   : > { %v979_v54 = vmul.f32 1.442695, %v978_v53  ;;  %v1131_v53 = vld [vmem:[%s2321_s16 + $0x18] sm:$0xff] }
 0x382   : > { %1156 = vmatpush.msrb.mxu0 %v1131_v53 }
 0x383   : > { %1668 = vpow2.f32 %v979_v54 }
 0x389   : > { %v1669_v55 = vpop.eup %1668 }
 0x38a   : > { %v981_v56 = vsel %vm896_vm7, %v1669_v55, 0.0 }
 0x38b   : > { %982 = vadd.xlane.f32.xlu0 %v981_v56 }
 0x395   : > { %921 = vrot.lane.b32.xlu2 %v862_v36, %s2007_s10 }
 0x39d   : > { %999 = vrot.lane.b32.xlu2 %v862_v36, %s2008_s17 }
 0x3f0   : > { %v905_v57 = vpop.xlane.xlu2 %904 }
 0x3f1   : > { %1670 = vrcp.f32 %v905_v57  ;;  %v917_v62 = vand.u32 2147483648, %v905_v57  ;;  %v915_v0 = vand.u32 2147483647, %v905_v57  ;;  %vm911_vm9 = vweird.f32 %v905_v57 }
 0x3f3   : > { %v918_v3 = vor.u32 1.1754944e-38, %v917_v62  ;;  %vm916_vm11 = vcmp.eq.f32.partialorder %v915_v0, 8.507059e+37 }
 0x3f7   : > { %v1671_v58 = vpop.eup %1670 }
 0x3f8   : > { %v907_v59 = vmul.f32 %v1671_v58, %v905_v57  ;;  %v922_v60 = vpop.permute.xlu2 %921  ;;  %vm912_vm8 = vweird.f32 %v1671_v58 }
 0x3f9   : > { %942 = vmatpush.msra.mxu2 %v922_v60  ;;  %vm913_vm10 = vmor %vm911_vm9, %vm912_vm8  ;;  %v1660_v60 = vld [vmem:[%s2552_s15] ss:$0 sm:$0xff] }
 0x3fa   : > { %v908_v61 = vsub.f32 1.0, %v907_v59 }
 0x3fc   : > { %v909_v63 = vmul.f32 %v1671_v58, %v908_v61 }
 0x3fe   : > { %v983_v1 = vpop.xlane.xlu0 %982  ;;  %v910_v2 = vadd.f32 %v1671_v58, %v909_v63  ;;  %v1661_v63 = vld [vmem:[%s2554_s2] ss:$0 sm:$0xff] }
 0x3ff   : > { %1672 = vrcp.f32 %v983_v1  ;;  %v995_v11 = vand.u32 2147483648, %v983_v1  ;;  %v993_v13 = vand.u32 2147483647, %v983_v1  ;;  %vm989_vm13 = vweird.f32 %v983_v1 }
 0x400   : > { %v1000_v4 = vpop.permute.xlu2 %999  ;;  %v914_v5 = vsel %vm913_vm10, %v1671_v58, %v910_v2  ;;  %1674 = vrcp.f32 %v2010_v30  ;;  %v1130_v2 = vld [vmem:[%s2321_s16 + $0x10] sm:$0xff]  ;;  %v1665_v30 = vld [vmem:[%s2279_s21] ss:$0 sm:$0xff] }
 0x401   : > { %1020 = vmatpush.msrb.mxu2 %v1000_v4  ;;  %v919_v6 = vsel %vm916_vm11, %v918_v3, %v914_v5  ;;  %v996_v15 = vor.u32 1.1754944e-38, %v995_v11  ;;  %vm994_vm15 = vcmp.eq.f32.partialorder %v993_v13, 8.507059e+37  ;;  %1157 = vmatpush.msrb.mxu0 %v1130_v2  ;;  %v1129_v3 = vld [vmem:[%s2321_s16 + $0x8] sm:$0xff]  ;;  %v1128_v4 = vld [vmem:[%s2321_s16] sm:$0xff] }
 0x402   : > { %v920_v7 = vmul.f32 %v1667_v50, %v919_v6  ;;  %v1662_v5 = vld [vmem:[%s775_s12] ss:$0 sm:$0xff] }
 0x403   : > { %1158 = vmatpush.msrb.mxu0 %v1129_v3 }
 0x404   : > { %1486 = vmatmul.msk.f32.vlgmr.msra.gmra.mxu2 %vm896_vm7, %v920_v7 }
 0x405   : > { %v1673_v8 = vpop.eup %1672  ;;  %1159 = vmatpush.msrb.mxu0 %v1128_v4 }
 0x406   : > { %v985_v9 = vmul.f32 %v1673_v8, %v983_v1  ;;  %vm990_vm12 = vweird.f32 %v1673_v8  ;;  %v1675_v31 = vpop.eup %1674 }
 0x407   : > { %vm991_vm14 = vmor %vm989_vm13, %vm990_vm12  ;;  %v1063_v32 = vmul.f32 32.0, %v1675_v31  ;;  %vm1067_vm0 = vweird.f32 %v1675_v31 }
 0x408   : > { %v986_v10 = vsub.f32 1.0, %v985_v9  ;;  %v1663_v9 = vld [vmem:[%s783_s1] ss:$0 sm:$0xff] }
 0x409   : > { %v1064_v33 = vsub.f32 1.0, %v1063_v32 }
 0x40a   : > { %v987_v12 = vmul.f32 %v1673_v8, %v986_v10 }
 0x40b   : > { %v1065_v34 = vmul.f32 %v1675_v31, %v1064_v33 }
 0x40c   : > { %v988_v14 = vadd.f32 %v1673_v8, %v987_v12 }
 0x40d   : > { %v1066_v36 = vadd.f32 %v1675_v31, %v1065_v34 }
 0x40e   : > { %v992_v16 = vsel %vm991_vm14, %v1673_v8, %v988_v14 }
 0x40f   : > { %v997_v17 = vsel %vm994_vm15, %v996_v15, %v992_v16  ;;  %v2368_v37 = vsel %vm1067_vm0, %v1675_v31, %v1066_v36 }
 0x410   : > { %v998_v18 = vmul.f32 %v1669_v55, %v997_v17 }
 0x412   : > { %1489 = vmatmul.msk.f32.vlgmr.msrb.gmra.mxu2 %vm896_vm7, %v998_v18 }
 0x487   : > { %v944_v23 = vpop.f32.mrf.mxu2 }
 0x495   : > { %v1022_v24 = vpop.f32.mrf.mxu2 }
 0x496   : > { %1026 = vrot.lane.b32.xlu2 %v1022_v24, %s2009_s29 }
 0x4f0   : > { %v1027_v25 = vpop.permute.xlu2 %1026 }
 0x4f1   : > { %v1029_v26 = vsel %vm871_vm6, %v944_v23, %v1027_v25 }
 0x4f2   : > { %1490 = vmatmul.msk.f32.vlgmr.msrb.gmra.mxu1 %vm841_vm5, %v1029_v26 }
 0x56f   : > { %v1054_v27 = vpop.f32.mrf.mxu1 }
 0x570   : > { %v1055_v28 = vadd.f32 %v1054_v27, %v2344_v35 }
 0x572   : > { %v1059_v29 = vsel %vm841_vm5, %v1055_v28, 0.0 }
 0x573   : > { %1060 = vadd.xlane.f32.xlu1 %v1059_v29 }
 0x5e6   : > { %v1061_v35 = vpop.xlane.xlu1 %1060 }
 0x5e7   : > { %v1069_v38 = vmul.f32 %v2368_v37, %v1061_v35 }
 0x5e9   : > { %v1070_v39 = vsub.f32 %v1055_v28, %v1069_v38  ;;  %v1664_v28 = vld [vmem:[%s786_s26] ss:$0 sm:$0xff] }
 0x5eb   : > { %v1071_v40 = vmul.f32 %v1070_v39, %v1070_v39 }
 0x5ed   : > { %v1072_v41 = vsel %vm841_vm5, %v1071_v40, 0.0 }
 0x5ee   : > { %1073 = vadd.xlane.f32.xlu2 %v1072_v41 }
 0x661   : > { %v1074_v49 = vpop.xlane.xlu2 %1073 }
 0x662   : > { %v1075_v50 = vmul.f32 %v1074_v49, %v2368_v37 }
 0x664   : > { %v1076_v52 = vadd.f32 1e-06, %v1075_v50 }
 0x666   : > { %1676 = vrsqrt.f32 %v1076_v52  ;;  %vm1083_vm2 = vweird.f32 %v1076_v52 }
 0x66c   : > { %v1677_v54 = vpop.eup %1676 }
 0x66d   : > { %v1078_v55 = vmul.f32 %v1677_v54, %v1076_v52  ;;  %vm1084_vm1 = vweird.f32 %v1677_v54 }
 0x66e   : > { %vm1085_vm3 = vmor %vm1083_vm2, %vm1084_vm1 }
 0x66f   : > { %v1079_v56 = vmul.f32 %v1677_v54, %v1078_v55 }
 0x671   : > { %v1080_v57 = vmul.f32 0.5, %v1079_v56 }
 0x673   : > { %v1081_v58 = vsub.f32 1.5, %v1080_v57 }
 0x675   : > { %v1082_v59 = vmul.f32 %v1677_v54, %v1081_v58 }
 0x677   : > { %v1086_v61 = vsel %vm1085_vm3, %v1677_v54, %v1082_v59 }
 0x678   : > { %v1087_v62 = vmul.f32 %v1086_v61, %v1070_v39 }
 0x67a   : > { %v1091_v0 = vmul.f32 %v1660_v60, %v1087_v62 }
 0x67c   : > { %v1095_v1 = vadd.f32 %v1661_v63, %v1091_v0 }
 0x67e   : > { %1491 = vmatmul.msk.f32.vlgmr.msrb.gmra.mxu3 %vm841_vm5, %v1095_v1 }
 0x701   : > { %v1124_v6 = vpop.f32.mrf.mxu3 }
 0x702   : > { %v1125_v7 = vadd.f32 %v1662_v5, %v1124_v6 }
 0x704   : > { %v1127_v8 = vmax.f32 %v1125_v7, 0.0 }
 0x706   : > { %1492 = vmatmul.msk.f32.vlgmr.msrb.gmra.mxu0 %vm1140_vm4, %v1127_v8 }
 0x783   : > { %v1161_v10 = vpop.f32.mrf.mxu0 }
 0x784   : > { %v1162_v11 = vadd.f32 %v1663_v9, %v1161_v10 }
 0x786   : > { %v1164_v12 = vadd.f32 %v1162_v11, %v1095_v1 }
 0x788   : > { %v1167_v13 = vsel %vm841_vm5, %v1164_v12, 0.0 }
 0x789   : > { %1168 = vadd.xlane.f32.xlu0 %v1167_v13 }
 0x7fc   : > { %v1169_v14 = vpop.xlane.xlu0 %1168 }
 0x7fd   : > { %v1170_v15 = vmul.f32 %v1169_v14, %v2368_v37 }
 0x7ff   : > { %v1171_v16 = vsub.f32 %v1164_v12, %v1170_v15 }
 0x801   : > { %v1172_v17 = vmul.f32 %v1171_v16, %v1171_v16 }
 0x803   : > { %v1173_v18 = vsel %vm841_vm5, %v1172_v17, 0.0 }
 0x804   : > { %1174 = vadd.xlane.f32.xlu1 %v1173_v18 }
 0x877   : > { %v1175_v19 = vpop.xlane.xlu1 %1174 }
 0x878   : > { %v1176_v20 = vmul.f32 %v1175_v19, %v2368_v37 }
 0x87a   : > { %v1177_v21 = vadd.f32 1e-06, %v1176_v20 }
 0x87c   : > { %1678 = vrsqrt.f32 %v1177_v21  ;;  %vm1184_vm7 = vweird.f32 %v1177_v21 }
 0x882   : > { %v1679_v22 = vpop.eup %1678 }
 0x883   : > { %v1179_v23 = vmul.f32 %v1679_v22, %v1177_v21  ;;  %vm1185_vm6 = vweird.f32 %v1679_v22 }
 0x884   : > { %vm1186_vm8 = vmor %vm1184_vm7, %vm1185_vm6 }
 0x885   : > { %v1180_v24 = vmul.f32 %v1679_v22, %v1179_v23 }
 0x887   : > { %v1181_v25 = vmul.f32 0.5, %v1180_v24 }
 0x889   : > { %v1182_v26 = vsub.f32 1.5, %v1181_v25 }
 0x88b   : > { %v1183_v27 = vmul.f32 %v1679_v22, %v1182_v26 }
 0x88d   : > { %v1187_v29 = vsel %vm1186_vm8, %v1679_v22, %v1183_v27 }
 0x88e   : > { %v1188_v31 = vmul.f32 %v1187_v29, %v1171_v16 }
 0x890   : > { %v1192_v32 = vmul.f32 %v1664_v28, %v1188_v31  ;;  %1201 = sbr.rel (%p1493_p7) target bundleno = 2198 (0x896), region = 112 }
 0x892   : > { %v1196_v33 = vadd.f32 %v1665_v30, %v1192_v32 }
 0x894   : > { %1197 = vst.msk [vmem:[#allocation2] sm:$0xff] %vm841_vm5, %v1196_v33 }
 0x895   : > { %1202 = vst.msk [vmem:[%s2333_s18] sm:$0xff] %vm841_vm5, %v1196_v33 }
 0x896 PF: > { %s2558_s20 = sld [smem:[#allocation25_spill]]  ;;  %s1216_s29 = sshll.u32 %s2333_s18, 4  ;;  %s1217_s29 = int_to_ptr.vmem [resolvable:$true] %s1216_s29 }
 0x897   : > { %s2560_s21 = sld [smem:[#allocation48_spill]]  ;;  %s1204_s23 = scalar_lea.sflag [#allocation5], %s2252_s3 }
 0x89c   : > { %s1495_s26 = sshll.u32 %s2558_s20, 3 }
 0x89d   : > { %s2561_s10 = smov %s2560_s21  ;;  %s1214_s17 = scalar_lea.hbm %s2560_s21, %s1495_s26 }
 0x89e   : > { %s1218_s0 = sshll.u32 %s1214_s17, 4  ;;  %s1880_s30 = scalar_lea.hbm %s2561_s10, 16  ;;  %s1219_s0 = int_to_ptr.hbm [resolvable:$true] %s1218_s0 }
 0x89f   : > { %s1874_s24 = sshra.s32 %s1219_s0, 4  ;;  %s1875_s24 = int_to_ptr.hbm [resolvable:$true] %s1874_s24 }
 0x8a0   : > { %s1876_s15 = scalar_lea.hbm %s1875_s24, 8  ;;  %p1881_p9 = scmp.lt.s32.totalorder %s1875_s24, %s2561_s10 }
 0x8a1   : > { %p1877_p12 = scmp.ne.s32.totalorder %s1875_s24, %s1876_s15  ;;  %p1882_p10 = scmp.lt.s32.totalorder %s1880_s30, %s1876_s15 }
 0x8a3   : > { %p1878_p2 = pnand %p1877_p12, %p2188_p13  ;;  %p1883_p11 = por %p1882_p10, %p1881_p9 }
 0x8a5   : > { %p1879_p6 = pneg %p1878_p2 }
 0x8a7   : > { %p1884_p4 = pnand %p1883_p11, %p1879_p6 }
 0x8a9   : > { %1887 = shalt.err (!%p1884_p4)
}
 0x8aa   : > { %1520 = dma.vmem_to_hbm [thread:$0]  (%p2188_p13), %s1217_s29, 128, %s1219_s0, %s1204_s23  }
 0x8ab PF: > { %s2562_s3 = sld [smem:[#allocation22_spill]]  ;;  %p1553_p5 = scmp.ge.s32.totalorder %s1998_s28, 2 }
 0x8ad   : > { %p1543_p8 = pnand %p1553_p5, %p2192_p0 }
 0x8af   : > { %p1544_p3 = pneg %p1543_p8 }
 0x8b1   : > { %s1230_s11 = sand.u32 1, %s2562_s3  }
 0x8b2   : > { %s1231_s14 = scalar_lea.sflag [#allocation5], %s1230_s11 }
 0x8b3   : > { %1953 = dma.done.wait (%p1544_p3), %s1231_s14, 128  }
 0x8b4   : > { %1955 = vsyncadd (%p1544_p3), %s1231_s14, 4294967168  ;;  %s38_s28 = sadd.s32 1, %s1998_s28   ;;  %s2564_s6 = sld [smem:[#allocation21_spill]] }
 0x8b5   : > { %p35_p1 = scmp.ge.s32.totalorder %s38_s28, 6   ;;  %s2565_s20 = sld [smem:[#allocation32_spill]] }
 0x8b6   : > { %s2566_s21 = sld [smem:[#allocation23_spill]]  ;;  %s2573_s18 = smov %s1962_s19 }
 0x8b7   : > { %s2567_s22 = sld [smem:[#allocation24_spill]] }
 0x8b8   : > { %s2568_s23 = sld [smem:[#allocation33_spill]]  ;;  %37 = sbr.rel (!%p35_p1) target bundleno = 30 (0x1e), region = 198 }
 0x8b9   : > { %s2569_s24 = sld [smem:[#allocation26_spill]] }
 0x8ba   : > { %s2570_s25 = sld [smem:[#allocation27_spill]]  ;;  %s2574_s19 = smov %s2564_s6 }
 0x8bb   : > { %s2571_s26 = sld [smem:[#allocation30_spill]] }
 0x8bc   : > { %s2572_s27 = sld [smem:[#allocation31_spill]] }
 0x8bd   :  { %1237 = vsyncpa [#allocation4], 1 }
 0x8be   :  { %1239 = vsyncpa [#allocation4 + $0x1], 1 }
 0x8bf   :  { %1240 = vsyncpa [#allocation7], 1 }
 0x8c0   :  { %1242 = vsyncpa [#allocation7 + $0x1], 1 }
 0x8c1   :  { %1243 = vsyncpa [#allocation10], 1 }
 0x8c2   :  { %1244 = vsyncpa [#allocation13], 1 }
 0x8c3   :  { %1246 = vsyncpa [#allocation13 + $0x1], 1 }
 0x8c4   :  { %1247 = vsyncpa [#allocation5], 1 }
 0x8c5   :  { %1249 = vsyncpa [#allocation5 + $0x1], 1 }

</bundles_post_ra>
